<compile_context>
chip_gen: v6e
topology: v6e:2x2x1
jax: 0.10.0
libtpu: 0.0.40
codegen_flags: <defaults>
</compile_context>

<pallas_src>
import functools

import jax
import jax.numpy as jnp
from jax.experimental import pallas as pl
from jax.experimental.pallas import tpu as pltpu

IN_DIM = 38      # 36 + 2
HID = 128
OUT_DIM = 37

PAD = 128        # lane-aligned padded output width
TM_MAX = 512     # batch tile cap (big tiles -> ~85% of HBM roofline)


def _round_up(n, m):
    return ((n + m - 1) // m) * m


def _qnet_kernel(x_ref, w1_ref, b1_ref, w2_ref, b2_ref, w3_ref, b3_ref, o_ref):
    """Fused MLP: relu(x@W1+b1) -> relu(.@W2+b2) -> .@W3+b3.

    x arrives f32 (tm, 38); weights are bf16; every dot accumulates in f32
    on the MXU; bias add + ReLU run in f32; output stored bf16 (tm, 128).
    """
    x = x_ref[...].astype(jnp.bfloat16)                               # (tm, 38)
    h1 = jnp.dot(x, w1_ref[...], preferred_element_type=jnp.float32)  # K=38 dot
    h1 = jnp.maximum(h1 + b1_ref[...], 0.0).astype(jnp.bfloat16)
    h2 = jnp.dot(h1, w2_ref[...], preferred_element_type=jnp.float32)
    h2 = jnp.maximum(h2 + b2_ref[...], 0.0).astype(jnp.bfloat16)
    out = jnp.dot(h2, w3_ref[...], preferred_element_type=jnp.float32) + b3_ref[...]
    o_ref[...] = out.astype(jnp.bfloat16)                             # full-lane store


def prepare_params(w1, b1, w2, b2, w3, b3):
    """One-time bf16 cast / output-lane padding of the weights (call once, reuse).

    Expects weights in (in, out) layout: w1 (38,128), w2 (128,128), w3 (128,37).
    (PyTorch nn.Linear stores (out, in); transpose before calling when porting
    real torch weights.)
    """
    assert w1.shape == (IN_DIM, HID), w1.shape
    assert w2.shape == (HID, HID), w2.shape
    assert w3.shape == (HID, OUT_DIM), w3.shape

    w1_p = w1.astype(jnp.bfloat16)                                  # (38, 128)
    b1_p = b1.astype(jnp.float32).reshape(1, HID)
    w2_p = w2.astype(jnp.bfloat16)                                  # (128, 128)
    b2_p = b2.astype(jnp.float32).reshape(1, HID)
    w3_p = jnp.zeros((HID, PAD), jnp.bfloat16).at[:, :OUT_DIM].set(
        w3.astype(jnp.bfloat16))                                    # (128, 128)
    b3_p = jnp.zeros((1, PAD), jnp.float32).at[0, :OUT_DIM].set(
        b3.astype(jnp.float32))
    return w1_p, b1_p, w2_p, b2_p, w3_p, b3_p


@functools.partial(jax.jit, static_argnames=("tm",))
def _qnet_forward_jit(x, w1_p, b1_p, w2_p, b2_p, w3_p, b3_p, *, tm):
    """x: (B, 38) f32 -> (B, 37) f32 via one fused pallas_call."""
    B = x.shape[0]
    grid = (pl.cdiv(B, tm),)                       # partial last block is masked
    const = lambda i: (0, 0)                       # weights/biases: VMEM-resident

    flops = 2 * B * (IN_DIM * HID + HID * HID + HID * PAD)
    weight_bytes = 2 * (IN_DIM * HID + HID * HID + HID * PAD) + 4 * (2 * HID + PAD)
    bytes_accessed = 4 * B * IN_DIM + weight_bytes + 2 * B * PAD

    out_p = pl.pallas_call(
        _qnet_kernel,
        out_shape=jax.ShapeDtypeStruct((B, PAD), jnp.bfloat16),
        grid=grid,
        in_specs=[
            pl.BlockSpec((tm, IN_DIM), lambda i: (i, 0)),   # x tile (streamed)
            pl.BlockSpec((IN_DIM, HID), const),             # W1 (38,128)
            pl.BlockSpec((1, HID), const),                  # b1
            pl.BlockSpec((HID, HID), const),                # W2
            pl.BlockSpec((1, HID), const),                  # b2
            pl.BlockSpec((HID, PAD), const),                # W3 (out-lane padded)
            pl.BlockSpec((1, PAD), const),                  # b3
        ],
        out_specs=pl.BlockSpec((tm, PAD), lambda i: (i, 0)),
        compiler_params=pltpu.CompilerParams(
            dimension_semantics=("parallel",),              # megacore on v7x
        ),
        cost_estimate=pl.CostEstimate(
            flops=flops, transcendentals=0, bytes_accessed=bytes_accessed),
    )(x, w1_p, b1_p, w2_p, b2_p, w3_p, b3_p)

    # Tiny fused slice+cast; kernel writeback stays lane-dense bf16.
    return out_p[:, :OUT_DIM].astype(jnp.float32)


def _pick_tm(B):
    # Multiple of 16; for small/medium batches split into >=2 grid steps so
    # both v7x TensorCores get work; cap at TM_MAX for big batches.
    return min(TM_MAX, max(16, _round_up(pl.cdiv(B, 2), 16)))


def qnet_forward(x, padded_params):
    """x: (B, 38) float32 -> (B, 37) float32.  padded_params from prepare_params."""
    tm = _pick_tm(x.shape[0])
    return _qnet_forward_jit(x.astype(jnp.float32), *padded_params, tm=tm)


def init_params(key):
    """Deterministic PyTorch-style (uniform +-1/sqrt(fan_in)) init, (in,out) layout."""
    ks = jax.random.split(key, 6)

    def lin(kw, kb, fan_in, fan_out):
        bound = 1.0 / jnp.sqrt(fan_in)
        w = jax.random.uniform(kw, (fan_in, fan_out), jnp.float32, -bound, bound)
        b = jax.random.uniform(kb, (fan_out,), jnp.float32, -bound, bound)
        return w, b

    w1, b1 = lin(ks[0], ks[1], IN_DIM, HID)
    w2, b2 = lin(ks[2], ks[3], HID, HID)
    w3, b3 = lin(ks[4], ks[5], HID, OUT_DIM)
    return w1, b1, w2, b2, w3, b3


def reference_forward_f32(x, w1, b1, w2, b2, w3, b3):
    """Pure f32 reference of the PyTorch module."""
    h1 = jnp.maximum(x @ w1 + b1, 0.0)
    h2 = jnp.maximum(h1 @ w2 + b2, 0.0)
    return h2 @ w3 + b3


def reference_forward_bf16(x, w1, b1, w2, b2, w3, b3):
    """Reference mirroring the kernel's bf16-weight / f32-accumulate numerics."""
    bf = lambda a: a.astype(jnp.bfloat16)
    h1 = jnp.maximum(
        jnp.dot(bf(x), bf(w1), preferred_element_type=jnp.float32) + b1, 0.0)
    h2 = jnp.maximum(
        jnp.dot(bf(h1), bf(w2), preferred_element_type=jnp.float32) + b2, 0.0)
    return jnp.dot(bf(h2), bf(w3), preferred_element_type=jnp.float32) + b3


# TODO(synk): Qnet.sample_action (env queries + python RNG + gather/argmax over
# valid actions) is host-side control logic, not part of the forward pass, and
# is intentionally not implemented as a kernel.

if __name__ == "__main__":
    key = jax.random.PRNGKey(0)
    k_param, k_x1, k_x2 = jax.random.split(key, 3)

    params = init_params(k_param)
    padded_params = prepare_params(*params)   # one-time bf16 cast / out padding

    ok = True
    # small batch (1 grid step) + medium batch (2 grid steps, partial last block)
    for k_x, batch in ((k_x1, 2), (k_x2, 300)):
        x = jax.random.normal(k_x, (batch, IN_DIM), jnp.float32)

        out = qnet_forward(x, padded_params)
        out = jax.block_until_ready(out)
        assert out.shape == (batch, OUT_DIM), out.shape

        ref_bf16 = reference_forward_bf16(x, *params)
        ref_f32 = reference_forward_f32(x, *params)
        ok &= bool(jnp.allclose(out, ref_bf16, atol=2e-3, rtol=2e-3))
        ok &= bool(jnp.allclose(out, ref_f32, atol=7.5e-2, rtol=7.5e-2))

    assert ok, "mismatch vs reference"
    print("KERNEL_OK")
</pallas_src>

<mosaic_0001>
module attributes {stable_mosaic.version = 11 : i64} {
  func.func @_qnet_kernel(%arg0: i32, %arg1: memref<16x38xf32, #tpu.memory_space<vmem>>, %arg2: memref<38x128xbf16, #tpu.memory_space<vmem>>, %arg3: memref<1x128xf32, #tpu.memory_space<vmem>>, %arg4: memref<128x128xbf16, #tpu.memory_space<vmem>>, %arg5: memref<1x128xf32, #tpu.memory_space<vmem>>, %arg6: memref<128x128xbf16, #tpu.memory_space<vmem>>, %arg7: memref<1x128xf32, #tpu.memory_space<vmem>>, %arg8: memref<16x128xbf16, #tpu.memory_space<vmem>>) attributes {dimension_semantics = [#tpu.dimension_semantics<parallel>], iteration_bounds = array<i64: 1>, scalar_prefetch = 0 : i64, scratch_operands = 0 : i64, tpu.core_type = #tpu.core_type<tc>, window_params = [{transform_indices = @transform_0, window_bounds = array<i64: 16, 38>}, {pipeline_mode = #tpu.pipeline_mode<synchronous>, transform_indices = @transform_1, window_bounds = array<i64: 38, 128>}, {pipeline_mode = #tpu.pipeline_mode<synchronous>, transform_indices = @transform_2, window_bounds = array<i64: 1, 128>}, {pipeline_mode = #tpu.pipeline_mode<synchronous>, transform_indices = @transform_3, window_bounds = array<i64: 128, 128>}, {pipeline_mode = #tpu.pipeline_mode<synchronous>, transform_indices = @transform_4, window_bounds = array<i64: 1, 128>}, {pipeline_mode = #tpu.pipeline_mode<synchronous>, transform_indices = @transform_5, window_bounds = array<i64: 128, 128>}, {pipeline_mode = #tpu.pipeline_mode<synchronous>, transform_indices = @transform_6, window_bounds = array<i64: 1, 128>}, {transform_indices = @transform_7, window_bounds = array<i64: 16, 128>}]} {
    %c0 = arith.constant 0 : index
    %c0_0 = arith.constant 0 : index
    %0 = vector.load %arg1[%c0, %c0_0] : memref<16x38xf32, #tpu.memory_space<vmem>>, vector<16x38xf32>
    %1 = arith.truncf %0 : vector<16x38xf32> to vector<16x38xbf16>
    %c0_1 = arith.constant 0 : index
    %c0_2 = arith.constant 0 : index
    %2 = vector.load %arg2[%c0_1, %c0_2] : memref<38x128xbf16, #tpu.memory_space<vmem>>, vector<38x128xbf16>
    %cst = arith.constant dense<0.000000e+00> : vector<16x128xf32>
    %3 = tpu.matmul %1, %2, %cst {dimension_numbers = #tpu.dot_dimension_numbers<[1], [0], [0], [1], [0, 0, 1, 1], [], []>} : vector<16x38xbf16>, vector<38x128xbf16>, vector<16x128xf32> -> vector<16x128xf32>
    %c0_3 = arith.constant 0 : index
    %c0_4 = arith.constant 0 : index
    %4 = vector.load %arg3[%c0_3, %c0_4] : memref<1x128xf32, #tpu.memory_space<vmem>>, vector<1x128xf32>
    %5 = vector.broadcast %4 : vector<1x128xf32> to vector<16x128xf32>
    %6 = arith.addf %3, %5 : vector<16x128xf32>
    %cst_5 = arith.constant 0.000000e+00 : f32
    %7 = vector.broadcast %cst_5 : f32 to vector<16x128xf32>
    %8 = arith.maximumf %6, %7 : vector<16x128xf32>
    %9 = arith.truncf %8 : vector<16x128xf32> to vector<16x128xbf16>
    %c0_6 = arith.constant 0 : index
    %c0_7 = arith.constant 0 : index
    %10 = vector.load %arg4[%c0_6, %c0_7] : memref<128x128xbf16, #tpu.memory_space<vmem>>, vector<128x128xbf16>
    %cst_8 = arith.constant dense<0.000000e+00> : vector<16x128xf32>
    %11 = tpu.matmul %9, %10, %cst_8 {dimension_numbers = #tpu.dot_dimension_numbers<[1], [0], [0], [1], [0, 0, 1, 1], [], []>} : vector<16x128xbf16>, vector<128x128xbf16>, vector<16x128xf32> -> vector<16x128xf32>
    %c0_9 = arith.constant 0 : index
    %c0_10 = arith.constant 0 : index
    %12 = vector.load %arg5[%c0_9, %c0_10] : memref<1x128xf32, #tpu.memory_space<vmem>>, vector<1x128xf32>
    %13 = vector.broadcast %12 : vector<1x128xf32> to vector<16x128xf32>
    %14 = arith.addf %11, %13 : vector<16x128xf32>
    %cst_11 = arith.constant 0.000000e+00 : f32
    %15 = vector.broadcast %cst_11 : f32 to vector<16x128xf32>
    %16 = arith.maximumf %14, %15 : vector<16x128xf32>
    %17 = arith.truncf %16 : vector<16x128xf32> to vector<16x128xbf16>
    %c0_12 = arith.constant 0 : index
    %c0_13 = arith.constant 0 : index
    %18 = vector.load %arg6[%c0_12, %c0_13] : memref<128x128xbf16, #tpu.memory_space<vmem>>, vector<128x128xbf16>
    %cst_14 = arith.constant dense<0.000000e+00> : vector<16x128xf32>
    %19 = tpu.matmul %17, %18, %cst_14 {dimension_numbers = #tpu.dot_dimension_numbers<[1], [0], [0], [1], [0, 0, 1, 1], [], []>} : vector<16x128xbf16>, vector<128x128xbf16>, vector<16x128xf32> -> vector<16x128xf32>
    %c0_15 = arith.constant 0 : index
    %c0_16 = arith.constant 0 : index
    %20 = vector.load %arg7[%c0_15, %c0_16] : memref<1x128xf32, #tpu.memory_space<vmem>>, vector<1x128xf32>
    %21 = vector.broadcast %20 : vector<1x128xf32> to vector<16x128xf32>
    %22 = arith.addf %19, %21 : vector<16x128xf32>
    %23 = arith.truncf %22 : vector<16x128xf32> to vector<16x128xbf16>
    %c0_17 = arith.constant 0 : index
    %c0_18 = arith.constant 0 : index
    %24 = vector.load %arg8[%c0_17, %c0_18] : memref<16x128xbf16, #tpu.memory_space<vmem>>, vector<16x128xbf16>
    tpu.vector_store %arg8[%c0_17, %c0_18], %23 {strides = array<i32>} : memref<16x128xbf16, #tpu.memory_space<vmem>>, vector<16x128xbf16>,
    return
  }
  func.func @transform_0(%arg0: i32) -> (i32, i32) {
    %c0_i32 = arith.constant 0 : i32
    %c0_i32_0 = arith.constant 0 : i32
    return %arg0, %c0_i32 : i32, i32
  }
  func.func @transform_1(%arg0: i32) -> (i32, i32) {
    %c0_i32 = arith.constant 0 : i32
    %c0_i32_0 = arith.constant 0 : i32
    %c0_i32_1 = arith.constant 0 : i32
    return %c0_i32, %c0_i32_0 : i32, i32
  }
  func.func @transform_2(%arg0: i32) -> (i32, i32) {
    %c0_i32 = arith.constant 0 : i32
    %c0_i32_0 = arith.constant 0 : i32
    %c0_i32_1 = arith.constant 0 : i32
    return %c0_i32, %c0_i32_0 : i32, i32
  }
  func.func @transform_3(%arg0: i32) -> (i32, i32) {
    %c0_i32 = arith.constant 0 : i32
    %c0_i32_0 = arith.constant 0 : i32
    %c0_i32_1 = arith.constant 0 : i32
    return %c0_i32, %c0_i32_0 : i32, i32
  }
  func.func @transform_4(%arg0: i32) -> (i32, i32) {
    %c0_i32 = arith.constant 0 : i32
    %c0_i32_0 = arith.constant 0 : i32
    %c0_i32_1 = arith.constant 0 : i32
    return %c0_i32, %c0_i32_0 : i32, i32
  }
  func.func @transform_5(%arg0: i32) -> (i32, i32) {
    %c0_i32 = arith.constant 0 : i32
    %c0_i32_0 = arith.constant 0 : i32
    %c0_i32_1 = arith.constant 0 : i32
    return %c0_i32, %c0_i32_0 : i32, i32
  }
  func.func @transform_6(%arg0: i32) -> (i32, i32) {
    %c0_i32 = arith.constant 0 : i32
    %c0_i32_0 = arith.constant 0 : i32
    %c0_i32_1 = arith.constant 0 : i32
    return %c0_i32, %c0_i32_0 : i32, i32
  }
  func.func @transform_7(%arg0: i32) -> (i32, i32) {
    %c0_i32 = arith.constant 0 : i32
    %c0_i32_0 = arith.constant 0 : i32
    return %arg0, %c0_i32 : i32, i32
  }
}

</mosaic_0001>

<bundles_post_ra>
// kernel: _qnet_forward_jit.1
= control target key start
LH: loop header
LB: loop body
LE: loop exit
PB: predicated region body
PF: predicated region fallthrough
CT: control target
= control target key end

     0   :  { %12 = vsyncpa [#allocation3], 0  ;;  %s827_s0 = inlined_call_operand.hbm [shape: f32[2,38], index: 0, kind: input, shape index: {}]   ;;  %s828_s1 = inlined_call_operand.hbm [shape: bf16[38,128], index: 1, kind: input, shape index: {}]   ;;  %s829_s2 = inlined_call_operand.vmem [shape: f32[1,128], index: 2, kind: input, shape index: {}]   ;;  %s830_s3 = inlined_call_operand.hbm [shape: bf16[128,128], index: 3, kind: input, shape index: {}]   ;;  %s831_s4 = inlined_call_operand.vmem [shape: f32[1,128], index: 4, kind: input, shape index: {}]   ;;  %s832_s5 = inlined_call_operand.hbm [shape: bf16[128,128], index: 5, kind: input, shape index: {}]   ;;  %s833_s6 = inlined_call_operand.vmem [shape: f32[1,128], index: 6, kind: input, shape index: {}]   ;;  %s834_s7 = inlined_call_operand.vmem [shape: bf16[2,128], index: 7, kind: output, shape index: {}]  }
   0x1   :  { %13 = vsyncpa [#allocation5], 0 }
   0x2   :  { %14 = vsyncpa [#allocation8], 0 }
   0x3   :  { %19 = vsyncadd [#allocation3], 224  ;;  %s718_s24 = smov [#allocation4]  }
   0x4   :  { %s32_s25 = sshll.u32 %s718_s24, 4  ;;  %s33_s25 = int_to_ptr.vmem [resolvable:$true] %s32_s25 }
   0x5   :  { %s640_s26 = scalar_lea.vmem %s33_s25, 320  ;;  %p645_p1 = scmp.lt.s32.totalorder %s33_s25, %s33_s25 }
   0x6   :  { %p641_p0 = scmp.ne.s32.totalorder %s33_s25, %s640_s26  ;;  %p646_p2 = scmp.lt.s32.totalorder %s640_s26, %s640_s26 }
   0x8   :  { %p647_p3 = por %p646_p2, %p645_p1 }
   0xa   :  { %p648_p4 = pnand %p647_p3, %p641_p0 }
   0xc   :  { %651 = shalt.err (!%p648_p4)
}
   0xd   :  { %s719_s27 = smov 64   ;;  %s720_s28 = smov 4  }
   0xe   :  { %38 = dma.hbm_to_vmem [thread:$0]  %s828_s1, 320, %s33_s25, [#allocation5], %s719_s27, %s719_s27, %s720_s28  }
   0xf   :  { %s721_s8 = smov [#allocation2]  }
  0x10   :  { %s20_s9 = sshll.u32 %s721_s8, 4  ;;  %s21_s9 = int_to_ptr.vmem [resolvable:$true] %s20_s9 }
  0x11   :  { %s660_s10 = scalar_lea.vmem %s21_s9, 32  ;;  %s664_s11 = scalar_lea.vmem %s21_s9, 256 }
  0x12   :  { %p661_p5 = scmp.ne.s32.totalorder %s21_s9, %s660_s10  ;;  %p665_p6 = scmp.lt.s32.totalorder %s21_s9, %s21_s9 }
  0x13   :  { %p666_p7 = scmp.lt.s32.totalorder %s664_s11, %s660_s10 }
  0x15   :  { %p667_p8 = por %p666_p7, %p665_p6 }
  0x17   :  { %p668_p9 = pnand %p667_p8, %p661_p5 }
  0x19   :  { %671 = shalt.err (!%p668_p9)
}
  0x1a   :  { %s722_s12 = smov 32   ;;  %s723_s13 = smov 2  }
  0x1b   :  { %26 = dma.hbm_to_vmem [thread:$0]  %s827_s0, 32, %s21_s9, [#allocation3], %s722_s12, %s722_s12, %s723_s13  }
  0x1c   :  { %s724_s16 = smov [#allocation6]   ;;  %s725_s1 = smov [#allocation7]  }
  0x1d   :  { %s46_s17 = sshll.u32 %s724_s16, 4  ;;  %s60_s18 = sshll.u32 %s725_s1, 4  ;;  %s47_s17 = int_to_ptr.vmem [resolvable:$true] %s46_s17  ;;  %s61_s18 = int_to_ptr.vmem [resolvable:$true] %s60_s18 }
  0x1e   :  { %s680_s19 = scalar_lea.vmem %s47_s17, 1024  ;;  %p685_p11 = scmp.lt.s32.totalorder %s47_s17, %s47_s17 }
  0x1f   :  { %p681_p10 = scmp.ne.s32.totalorder %s47_s17, %s680_s19  ;;  %p686_p12 = scmp.lt.s32.totalorder %s680_s19, %s680_s19 }
  0x21   :  { %p687_p13 = por %p686_p12, %p685_p11 }
  0x23   :  { %p688_p0 = pnand %p687_p13, %p681_p10 }
  0x25   :  { %691 = shalt.err (!%p688_p0)
}
  0x26   :  { %52 = dma.hbm_to_vmem [thread:$0]  %s830_s3, 1024, %s47_s17, [#allocation5], %s719_s27, %s719_s27, %s720_s28  }
  0x27   :  { %s700_s0 = scalar_lea.vmem %s61_s18, 1024  ;;  %p705_p2 = scmp.lt.s32.totalorder %s61_s18, %s61_s18 }
  0x28   :  { %p701_p1 = scmp.ne.s32.totalorder %s61_s18, %s700_s0  ;;  %p706_p3 = scmp.lt.s32.totalorder %s700_s0, %s700_s0 }
  0x2a   :  { %p707_p4 = por %p706_p3, %p705_p2 }
  0x2c   :  { %p708_p5 = pnand %p707_p4, %p701_p1 }
  0x2e   :  { %711 = shalt.err (!%p708_p5)
}
  0x2f   :  { %66 = dma.hbm_to_vmem [thread:$0]  %s832_s5, 1024, %s61_s18, [#allocation8], %s719_s27, %s719_s27, %s720_s28  }
  0x30   :  { %712 = dma.done.wait [#allocation3], 256  }
  0x31   :  { %713 = vsyncadd [#allocation3], 4294967040 }
  0x32   :  { %714 = dma.done.wait [#allocation5], 1344  }
  0x33   :  { %715 = vsyncadd [#allocation5], 4294965952 }
  0x34   :  { %716 = dma.done.wait [#allocation8], 1024  }
  0x35   :  { %717 = vsyncadd [#allocation8], 4294966272  ;;  %v726_v0 = vmov 0.0   ;;  %vm727_vm0 = vmmov 0   ;;  %vm116_vm1 = vcmask 1042432   ;;  %v614_v3 = vld [vmem:[#allocation4 + $0x8] sm:$0xff]   ;;  %v397_v46 = vlaneseq }
  0x36   :  { %552 = vmatprep.subr.bf16.mxu0 %v726_v0  ;;  %558 = vmatprep.mubr.msk.bf16.mxu0 %vm727_vm0, %v726_v0  ;;  %v613_v1 = vld [vmem:[#allocation4 + $0x10] ss:$0 sps:$4 sm:$0x77]   ;;  %v615_v5 = vld [vmem:[#allocation4] sm:$0xff]   ;;  %v83_v8 = vld [vmem:[#allocation2 + $0x8] sm:$0xff]  ;;  %vm112_vm2 = vcmask 310272  }
  0x37   :  { %562 = vmatprep.subr.bf16.mxu1 %v726_v0  ;;  %578 = vmatprep.mubr.msk.bf16.mxu1 %vm727_vm0, %v726_v0  ;;  %v118_v2 = vsel %vm116_vm1, %v613_v1, 0  ;;  %v616_v4 = vld [vmem:[#allocation6 + $0x38] sm:$0xff]   ;;  %v617_v7 = vld [vmem:[#allocation6 + $0x30] sm:$0xff]   ;;  %v618_v9 = vld [vmem:[#allocation6 + $0x28] sm:$0xff]   ;;  %v728_v44 = vmov 1966171168  }
  0x38   :  { %553 = vmatpush3.bf16.msra.mxu0 %v118_v2  ;;  %v82_v6 = vld [vmem:[#allocation2] sm:$0xff]  ;;  %563 = vmatpush3.bf16.msra.mxu1 %v616_v4  ;;  %v621_v13 = vld [vmem:[#allocation6 + $0x10] sm:$0xff]   ;;  %v622_v14 = vld [vmem:[#allocation6 + $0x8] sm:$0xff]   ;;  %v395_v45 = vunpack.c.l.s4 %v728_v44  ;;  %v398_v49 = vshrl.u32 %v397_v46, 7 }
  0x39   :  { %554 = vmatprep.subr.bf16.mxu0 %v726_v0  ;;  %564 = vmatprep.subr.bf16.mxu1 %v726_v0  ;;  %v84_v10 = vpack.c.bf16 %v83_v8, %v82_v6  ;;  %v619_v11 = vld [vmem:[#allocation6 + $0x20] sm:$0xff]   ;;  %v620_v12 = vld [vmem:[#allocation6 + $0x18] sm:$0xff]   ;;  %v625_v17 = vld [vmem:[#allocation7 + $0x30] sm:$0xff]  }
  0x3a   :  { %v623_v15 = vld [vmem:[#allocation6] sm:$0xff]   ;;  %v624_v16 = vld [vmem:[#allocation7 + $0x38] sm:$0xff]   ;;  %v626_v18 = vld [vmem:[#allocation7 + $0x28] sm:$0xff]   ;;  %v396_v48 = vunpack.c.0.s8 %v395_v45 }
  0x3b   :  { %v627_v19 = vld [vmem:[#allocation7 + $0x20] sm:$0xff]   ;;  %v628_v20 = vld [vmem:[#allocation7 + $0x18] sm:$0xff]   ;;  %v629_v31 = vld [vmem:[#allocation7 + $0x10] sm:$0xff]  }
  0x3c   :  { %555 = vmatpush3.bf16.msra.mxu0 %v614_v3  ;;  %565 = vmatpush3.bf16.msra.mxu1 %v617_v7  ;;  %v502_v21 = vld [vmem:[%s829_s2] ss:$0 sm:$0xff]  ;;  %v630_v32 = vld [vmem:[#allocation7 + $0x8] sm:$0xff]   ;;  %v631_v33 = vld [vmem:[#allocation7] sm:$0xff]   ;;  %v399_v55 = vsub.s32 %v396_v48, %v398_v49 }
  0x3d   :  { %556 = vmatprep.subr.bf16.mxu0 %v726_v0  ;;  %566 = vmatprep.subr.bf16.mxu1 %v726_v0  ;;  %v507_v34 = vld [vmem:[%s831_s4] ss:$0 sm:$0xff] }
  0x3e   :  { %v516_v50 = vld [vmem:[%s833_s6] ss:$0 sm:$0xff] }
  0x40   :  { %557 = vmatpush3.bf16.msra.mxu0 %v615_v5  ;;  %567 = vmatpush3.bf16.msra.mxu1 %v618_v9 }
  0x41   :  { %582 = vmatprep.subr.bf16.mxu0 %v726_v0  ;;  %568 = vmatprep.subr.bf16.mxu1 %v726_v0 }
  0x43   :  { %559 = vmatmul.mubr.msk.bf16.vlgmr.msra.gmra.mxu0 %vm112_vm2, %v84_v10 }
  0x44   :  { %598 = vmatprep.mubr.msk.bf16.mxu0 %vm727_vm0, %v726_v0  ;;  %569 = vmatpush3.bf16.msra.mxu1 %v619_v11 }
  0x45   :  { %570 = vmatprep.subr.bf16.mxu1 %v726_v0  ;;  %583 = vmatpush3.bf16.msra.mxu0 %v624_v16 }
  0x46   :  { %584 = vmatprep.subr.bf16.mxu0 %v726_v0 }
  0x48   :  { %571 = vmatpush3.bf16.msra.mxu1 %v620_v12 }
  0x49   :  { %572 = vmatprep.subr.bf16.mxu1 %v726_v0  ;;  %585 = vmatpush3.bf16.msra.mxu0 %v625_v17 }
  0x4a   :  { %586 = vmatprep.subr.bf16.mxu0 %v726_v0 }
  0x4c   :  { %573 = vmatpush3.bf16.msra.mxu1 %v621_v13 }
  0x4d   :  { %574 = vmatprep.subr.bf16.mxu1 %v726_v0  ;;  %587 = vmatpush3.bf16.msra.mxu0 %v626_v18 }
  0x4e   :  { %588 = vmatprep.subr.bf16.mxu0 %v726_v0 }
  0x50   :  { %575 = vmatpush3.bf16.msra.mxu1 %v622_v14 }
  0x51   :  { %576 = vmatprep.subr.bf16.mxu1 %v726_v0  ;;  %589 = vmatpush3.bf16.msra.mxu0 %v627_v19 }
  0x52   :  { %590 = vmatprep.subr.bf16.mxu0 %v726_v0 }
  0x54   :  { %577 = vmatpush3.bf16.msra.mxu1 %v623_v15 }
  0x55   :  { %591 = vmatpush3.bf16.msra.mxu0 %v628_v20 }
  0x56   :  { %592 = vmatprep.subr.bf16.mxu0 %v726_v0 }
  0x59   :  { %593 = vmatpush3.bf16.msra.mxu0 %v629_v31 }
  0x5a   :  { %594 = vmatprep.subr.bf16.mxu0 %v726_v0 }
  0x5d   :  { %595 = vmatpush3.bf16.msra.mxu0 %v630_v32 }
  0x5e   :  { %596 = vmatprep.subr.bf16.mxu0 %v726_v0 }
  0x61   :  { %597 = vmatpush3.bf16.msra.mxu0 %v631_v33 }
 0x103   :  { %v154_v22 = vpop.f32.mrf.mxu0 }
 0x104   :  { %v155_v24 = vadd.f32 %v502_v21, %v154_v22 }
 0x105   :  { %v560_v23 = vpop.f32.mrf.mxu0 }
 0x106   :  { %v161_v28 = vmax.f32 %v155_v24, 0.0 }
 0x107   :  { %v157_v25 = vpop.f32.mrf.mxu0 }
 0x108   :  { %v158_v26 = vadd.f32 %v502_v21, %v157_v25 }
 0x109   :  { %v561_v27 = vpop.f32.mrf.mxu0 }
 0x10a   :  { %v162_v29 = vmax.f32 %v158_v26, 0.0 }
 0x10c   :  { %v163_v30 = vpack.c.bf16 %v162_v29, %v161_v28 }
 0x10e   :  { %579 = vmatmul.mubr.bf16.vlgmr.msra.gmra.mxu1 %v163_v30 }
 0x1ce   :  { %v269_v35 = vpop.f32.mrf.mxu1 }
 0x1cf   :  { %v270_v37 = vadd.f32 %v507_v34, %v269_v35 }
 0x1d0   :  { %v580_v36 = vpop.f32.mrf.mxu1 }
 0x1d1   :  { %v276_v41 = vmax.f32 %v270_v37, 0.0 }
 0x1d2   :  { %v272_v38 = vpop.f32.mrf.mxu1 }
 0x1d3   :  { %v273_v39 = vadd.f32 %v507_v34, %v272_v38 }
 0x1d4   :  { %v581_v40 = vpop.f32.mrf.mxu1 }
 0x1d5   :  { %v277_v42 = vmax.f32 %v273_v39, 0.0 }
 0x1d7   :  { %v278_v43 = vpack.c.bf16 %v277_v42, %v276_v41 }
 0x1d9   :  { %599 = vmatmul.mubr.bf16.vlgmr.msra.gmra.mxu0 %v278_v43 }
 0x299   :  { %v384_v47 = vpop.f32.mrf.mxu0 }
 0x29a   :  { %v385_v53 = vadd.f32 %v516_v50, %v384_v47 }
 0x29b   :  { %v600_v51 = vpop.f32.mrf.mxu0 }
 0x29d   :  { %v387_v52 = vpop.f32.mrf.mxu0 }
 0x29e   :  { %v388_v54 = vadd.f32 %v516_v50, %v387_v52 }
 0x29f   :  { %v601_v56 = vpop.f32.mrf.mxu0 }
 0x2a0   :  { %v391_v57 = vpack.c.bf16 %v388_v54, %v385_v53 }
 0x2a2   :  { %v400_v58 = vrot.slane %v391_v57, %v399_v55 }
 0x2a4   :  { %526 = vst.sshfl [vmem:[#allocation9] sm:$0x1 pattern:$0x73625140] %v400_v58 }
 0x2ab   :  { %v476_v59 = vld [vmem:[#allocation9] sm:$0x1] }
 0x2ac   :  { %477 = vst [vmem:[%s834_s7] sm:$0x1] %v476_v59 }
 0x2ad   :  { %495 = vsyncpa [#allocation3], 1 }
 0x2ae   :  { %496 = vsyncpa [#allocation5], 1 }
 0x2af   :  { %497 = vsyncpa [#allocation8], 1 }

</bundles_post_ra>
